<compile_context>
chip_gen: v5e
topology: v5e:2x2
jax: 0.10.0
libtpu: 0.0.40
codegen_flags: <defaults>
</compile_context>

<pallas_src>
import functools

import jax
import jax.numpy as jnp
from jax.experimental import pallas as pl
from jax.experimental.pallas import tpu as pltpu


def _round_up(x, m):
    return (x + m - 1) // m * m


# ----------------------------------------------------------------------------
# Kernel
# ----------------------------------------------------------------------------
def _encdec_kernel(x_ref,
                   w1_ref, b1_ref,
                   w2_ref, b2_ref,
                   w3_ref, b3_ref,
                   w4_ref, b4_ref,
                   o_ref):
    """One batch tile of the fused encoder/decoder chain (all on-chip)."""
    cd = w1_ref.dtype  # MXU operand dtype (bf16 by default); accumulation is f32.

    # Cast input on the VPU (free filler under MXU-bound schedule).
    h = x_ref[...].astype(cd)

    # encoder_1  (dropout -> identity, eval mode)
    h = (jnp.dot(h, w1_ref[...], preferred_element_type=jnp.float32)
         + b1_ref[...]).astype(cd)
    # encoder_2
    h = (jnp.dot(h, w2_ref[...], preferred_element_type=jnp.float32)
         + b2_ref[...]).astype(cd)
    # decoder_1
    h = (jnp.dot(h, w3_ref[...], preferred_element_type=jnp.float32)
         + b3_ref[...]).astype(cd)
    # decoder_2 (keep f32 result; cast once into the output dtype)
    h = jnp.dot(h, w4_ref[...], preferred_element_type=jnp.float32) + b4_ref[...]

    o_ref[...] = h.astype(o_ref.dtype)


# ----------------------------------------------------------------------------
# Tiling / VMEM heuristics
# ----------------------------------------------------------------------------
def _vmem_capacity_bytes():
    """Per-core VMEM capacity; conservative v7x default if query fails."""
    try:
        cap = int(pltpu.get_tpu_info().vmem_capacity_bytes)
        if cap > 0:
            return cap
    except Exception:
        pass
    return 64 * 2**20  # v7x per-TC; safe lower bound for v5e/v6e too.


def _vmem_bytes(tile_b, Dp, d34p, d12p, w_isz, x_isz, o_isz):
    """Rough VMEM working-set estimate (single-buffered weights)."""
    w = (Dp * d34p + d34p * d12p + d12p * d34p + d34p * Dp) * w_isz
    b = (2 * d34p + d12p + Dp) * 4
    io = 2 * tile_b * Dp * (x_isz + o_isz)          # double-buffered x + out
    act = 2 * tile_b * max(Dp, d34p) * 4            # f32 accum / intermediate headroom
    return w + b + io + act


def _pick_tile_b(B, fits):
    """16-aligned batch tile dividing B; prefer an even grid-step count >= 2
    (v7x megacore load balance), then >= 2 steps (pipelining), then largest."""
    cands = sorted({t for t in range(16, B + 1, 16) if B % t == 0}, reverse=True)
    if not cands:
        return B                      # tiny/awkward B: single full-array block
    fitting = [t for t in cands if fits(t)]
    if not fitting:
        return min(cands)             # smallest legal tile (huge-D edge case)
    even = [t for t in fitting if (B // t) >= 2 and (B // t) % 2 == 0]
    if even:
        return max(even)
    multi = [t for t in fitting if (B // t) >= 2]
    if multi:
        return max(multi)
    return max(fitting)


# ----------------------------------------------------------------------------
# One-time parameter preparation (pad + cast hoisted out of the forward path)
# ----------------------------------------------------------------------------
def prepare_params(params, *, compute_dtype=jnp.bfloat16, lane_multiple=128):
    """Pad feature dims up to 128 lanes (exact math: padding is zero) and cast
    weights to the MXU compute dtype ONCE.  Biases stay f32."""
    D = params["w1"].shape[0]
    d34, d12 = D * 3 // 4, D // 2
    Dp = _round_up(D, lane_multiple)
    d34p = _round_up(d34, lane_multiple)
    d12p = _round_up(d12, lane_multiple)

    def pad2(a, r, c):
        return jnp.pad(a, ((0, r - a.shape[0]), (0, c - a.shape[1])))

    cd = compute_dtype
    prepared = {
        "w1": pad2(params["w1"], Dp, d34p).astype(cd),
        "w2": pad2(params["w2"], d34p, d12p).astype(cd),
        "w3": pad2(params["w3"], d12p, d34p).astype(cd),
        "w4": pad2(params["w4"], d34p, Dp).astype(cd),
        "b1": pad2(params["b1"], 1, d34p).astype(jnp.float32),
        "b2": pad2(params["b2"], 1, d12p).astype(jnp.float32),
        "b3": pad2(params["b3"], 1, d34p).astype(jnp.float32),
        "b4": pad2(params["b4"], 1, Dp).astype(jnp.float32),
    }
    return jax.tree_util.tree_map(jnp.asarray, prepared)


# ----------------------------------------------------------------------------
# Forward
# ----------------------------------------------------------------------------
@functools.partial(jax.jit, static_argnames=("out_dtype",))
def encoder_decoder_forward(x, prepared, out_dtype=None):
    """x: (B, D) float32.  prepared: output of prepare_params()."""
    B, D = x.shape
    Dp = prepared["w1"].shape[0]
    d34p = prepared["w1"].shape[1]
    d12p = prepared["w2"].shape[1]
    out_dtype = x.dtype if out_dtype is None else out_dtype

    w_isz = jnp.dtype(prepared["w1"].dtype).itemsize
    x_isz = jnp.dtype(x.dtype).itemsize
    o_isz = jnp.dtype(out_dtype).itemsize

    # Only pad the activations when the feature dim is not already lane-aligned
    # (the kernel does the bf16 cast itself -- no wrapper cast pass).
    xp = x if D == Dp else jnp.pad(x, ((0, 0), (0, Dp - D)))

    # Generation-aware VMEM budget (v7x: ~48/56 MiB; v5e/v6e: ~96/112 MiB).
    cap = _vmem_capacity_bytes()
    budget = (cap * 3) // 4
    limit_cap = (cap * 7) // 8

    def fits(t):
        return _vmem_bytes(t, Dp, d34p, d12p, w_isz, x_isz, o_isz) <= budget

    tile_b = _pick_tile_b(B, fits)
    assert B % tile_b == 0, "batch must be divisible by tile_b"
    grid = (B // tile_b,)

    need = _vmem_bytes(tile_b, Dp, d34p, d12p, w_isz, x_isz, o_isz)
    vmem_limit = int(min(max(2 * need, 32 * 2**20), limit_cap))

    # Weights / biases: grid-invariant, single-buffered resident blocks.
    def wspec(shape):
        return pl.BlockSpec(shape, lambda i: (0, 0),
                            pipeline_mode=pl.Buffered(1))

    in_specs = [
        pl.BlockSpec((tile_b, Dp), lambda i: (i, 0)),   # x tile (f32, cast in-kernel)
        wspec((Dp, d34p)), wspec((1, d34p)),            # encoder_1
        wspec((d34p, d12p)), wspec((1, d12p)),          # encoder_2
        wspec((d12p, d34p)), wspec((1, d34p)),          # decoder_1
        wspec((d34p, Dp)), wspec((1, Dp)),              # decoder_2
    ]
    out_specs = pl.BlockSpec((tile_b, Dp), lambda i: (i, 0))

    flops = 2 * B * (Dp * d34p + d34p * d12p + d12p * d34p + d34p * Dp)
    bytes_accessed = (B * Dp * (x_isz + o_isz)
                      + (Dp * d34p + d34p * d12p + d12p * d34p + d34p * Dp) * w_isz
                      + (2 * d34p + d12p + Dp) * 4)
    cost = pl.CostEstimate(flops=flops, transcendentals=0,
                           bytes_accessed=bytes_accessed)

    out_padded = pl.pallas_call(
        _encdec_kernel,
        out_shape=jax.ShapeDtypeStruct((B, Dp), out_dtype),
        grid_spec=pltpu.PrefetchScalarGridSpec(
            num_scalar_prefetch=0,
            grid=grid,
            in_specs=in_specs,
            out_specs=out_specs,
        ),
        compiler_params=pltpu.CompilerParams(
            dimension_semantics=("parallel",),
            vmem_limit_bytes=vmem_limit,
        ),
        cost_estimate=cost,
    )(xp, prepared["w1"], prepared["b1"], prepared["w2"], prepared["b2"],
      prepared["w3"], prepared["b3"], prepared["w4"], prepared["b4"])

    return out_padded if D == Dp else out_padded[:, :D]


# ----------------------------------------------------------------------------
# Params / reference
# ----------------------------------------------------------------------------
def init_params(key, input_size):
    """PyTorch nn.Linear-style init (U(-1/sqrt(fan_in), 1/sqrt(fan_in))).
    Weights stored transposed (in, out); biases as (1, out)."""
    D = input_size
    dims = [(D, D * 3 // 4),        # encoder_1
            (D * 3 // 4, D // 2),   # encoder_2
            (D // 2, D * 3 // 4),   # decoder_1
            (D * 3 // 4, D)]        # decoder_2
    params = {}
    for idx, (fan_in, fan_out) in enumerate(dims, start=1):
        key, kw, kb = jax.random.split(key, 3)
        bound = 1.0 / jnp.sqrt(jnp.float32(fan_in))
        params[f"w{idx}"] = jax.random.uniform(
            kw, (fan_in, fan_out), jnp.float32, -bound, bound)
        params[f"b{idx}"] = jax.random.uniform(
            kb, (1, fan_out), jnp.float32, -bound, bound)
    return params


def reference_forward(x, params, compute_dtype=jnp.float32):
    """Pure-JAX reference (eval-mode dropout)."""
    h = x
    for i in (1, 2, 3, 4):
        w = params[f"w{i}"].astype(compute_dtype)
        h = jnp.dot(h.astype(compute_dtype), w,
                    preferred_element_type=jnp.float32) + params[f"b{i}"]
    return h


if __name__ == "__main__":
    key = jax.random.PRNGKey(0)

    batch = 64
    input_size = 32          # widths: 32 -> 24 -> 16 -> 24 -> 32
    hidden_size = 64         # unused by forward(); kept for signature parity

    key, kx, kp = jax.random.split(key, 3)
    x = jax.random.normal(kx, (batch, input_size), jnp.float32)
    params = init_params(kp, input_size)

    # One-time weight prep (pad + bf16 cast hoisted out of the forward path).
    prepared = prepare_params(params)

    out = encoder_decoder_forward(x, prepared)
    out = jax.block_until_ready(out)
    assert out.shape == (batch, input_size)
    assert out.dtype == x.dtype

    ref_bf16 = reference_forward(x, params, compute_dtype=jnp.bfloat16)
    ref_f32 = reference_forward(x, params, compute_dtype=jnp.float32)
    assert jnp.allclose(out, ref_bf16, atol=2e-2, rtol=2e-2), "mismatch vs bf16 reference"
    assert jnp.allclose(out, ref_f32, atol=5e-2, rtol=5e-2), "mismatch vs f32 reference"

    print("KERNEL_OK")
</pallas_src>

<mosaic_0001>
module attributes {stable_mosaic.version = 11 : i64} {
  func.func @_encdec_kernel(%arg0: i32, %arg1: memref<32x128xf32, #tpu.memory_space<vmem>>, %arg2: memref<128x128xbf16, #tpu.memory_space<vmem>>, %arg3: memref<1x128xf32, #tpu.memory_space<vmem>>, %arg4: memref<128x128xbf16, #tpu.memory_space<vmem>>, %arg5: memref<1x128xf32, #tpu.memory_space<vmem>>, %arg6: memref<128x128xbf16, #tpu.memory_space<vmem>>, %arg7: memref<1x128xf32, #tpu.memory_space<vmem>>, %arg8: memref<128x128xbf16, #tpu.memory_space<vmem>>, %arg9: memref<1x128xf32, #tpu.memory_space<vmem>>, %arg10: memref<32x128xf32, #tpu.memory_space<vmem>>) attributes {dimension_semantics = [#tpu.dimension_semantics<parallel>], iteration_bounds = array<i64: 2>, scalar_prefetch = 0 : i64, scratch_operands = 0 : i64, tpu.core_type = #tpu.core_type<tc>, window_params = [{transform_indices = @transform_0, window_bounds = array<i64: 32, 128>}, {pipeline_mode = #tpu.pipeline_mode<synchronous>, transform_indices = @transform_1, window_bounds = array<i64: 128, 128>}, {pipeline_mode = #tpu.pipeline_mode<synchronous>, transform_indices = @transform_2, window_bounds = array<i64: 1, 128>}, {pipeline_mode = #tpu.pipeline_mode<synchronous>, transform_indices = @transform_3, window_bounds = array<i64: 128, 128>}, {pipeline_mode = #tpu.pipeline_mode<synchronous>, transform_indices = @transform_4, window_bounds = array<i64: 1, 128>}, {pipeline_mode = #tpu.pipeline_mode<synchronous>, transform_indices = @transform_5, window_bounds = array<i64: 128, 128>}, {pipeline_mode = #tpu.pipeline_mode<synchronous>, transform_indices = @transform_6, window_bounds = array<i64: 1, 128>}, {pipeline_mode = #tpu.pipeline_mode<synchronous>, transform_indices = @transform_7, window_bounds = array<i64: 128, 128>}, {pipeline_mode = #tpu.pipeline_mode<synchronous>, transform_indices = @transform_8, window_bounds = array<i64: 1, 128>}, {transform_indices = @transform_9, window_bounds = array<i64: 32, 128>}]} {
    %c0 = arith.constant 0 : index
    %c0_0 = arith.constant 0 : index
    %0 = vector.load %arg1[%c0, %c0_0] : memref<32x128xf32, #tpu.memory_space<vmem>>, vector<32x128xf32>
    %1 = arith.truncf %0 : vector<32x128xf32> to vector<32x128xbf16>
    %c0_1 = arith.constant 0 : index
    %c0_2 = arith.constant 0 : index
    %2 = vector.load %arg2[%c0_1, %c0_2] : memref<128x128xbf16, #tpu.memory_space<vmem>>, vector<128x128xbf16>
    %cst = arith.constant dense<0.000000e+00> : vector<32x128xf32>
    %3 = tpu.matmul %1, %2, %cst {dimension_numbers = #tpu.dot_dimension_numbers<[1], [0], [0], [1], [0, 0, 1, 1], [], []>} : vector<32x128xbf16>, vector<128x128xbf16>, vector<32x128xf32> -> vector<32x128xf32>
    %c0_3 = arith.constant 0 : index
    %c0_4 = arith.constant 0 : index
    %4 = vector.load %arg3[%c0_3, %c0_4] : memref<1x128xf32, #tpu.memory_space<vmem>>, vector<1x128xf32>
    %5 = vector.broadcast %4 : vector<1x128xf32> to vector<32x128xf32>
    %6 = arith.addf %3, %5 : vector<32x128xf32>
    %7 = arith.truncf %6 : vector<32x128xf32> to vector<32x128xbf16>
    %c0_5 = arith.constant 0 : index
    %c0_6 = arith.constant 0 : index
    %8 = vector.load %arg4[%c0_5, %c0_6] : memref<128x128xbf16, #tpu.memory_space<vmem>>, vector<128x128xbf16>
    %cst_7 = arith.constant dense<0.000000e+00> : vector<32x128xf32>
    %9 = tpu.matmul %7, %8, %cst_7 {dimension_numbers = #tpu.dot_dimension_numbers<[1], [0], [0], [1], [0, 0, 1, 1], [], []>} : vector<32x128xbf16>, vector<128x128xbf16>, vector<32x128xf32> -> vector<32x128xf32>
    %c0_8 = arith.constant 0 : index
    %c0_9 = arith.constant 0 : index
    %10 = vector.load %arg5[%c0_8, %c0_9] : memref<1x128xf32, #tpu.memory_space<vmem>>, vector<1x128xf32>
    %11 = vector.broadcast %10 : vector<1x128xf32> to vector<32x128xf32>
    %12 = arith.addf %9, %11 : vector<32x128xf32>
    %13 = arith.truncf %12 : vector<32x128xf32> to vector<32x128xbf16>
    %c0_10 = arith.constant 0 : index
    %c0_11 = arith.constant 0 : index
    %14 = vector.load %arg6[%c0_10, %c0_11] : memref<128x128xbf16, #tpu.memory_space<vmem>>, vector<128x128xbf16>
    %cst_12 = arith.constant dense<0.000000e+00> : vector<32x128xf32>
    %15 = tpu.matmul %13, %14, %cst_12 {dimension_numbers = #tpu.dot_dimension_numbers<[1], [0], [0], [1], [0, 0, 1, 1], [], []>} : vector<32x128xbf16>, vector<128x128xbf16>, vector<32x128xf32> -> vector<32x128xf32>
    %c0_13 = arith.constant 0 : index
    %c0_14 = arith.constant 0 : index
    %16 = vector.load %arg7[%c0_13, %c0_14] : memref<1x128xf32, #tpu.memory_space<vmem>>, vector<1x128xf32>
    %17 = vector.broadcast %16 : vector<1x128xf32> to vector<32x128xf32>
    %18 = arith.addf %15, %17 : vector<32x128xf32>
    %19 = arith.truncf %18 : vector<32x128xf32> to vector<32x128xbf16>
    %c0_15 = arith.constant 0 : index
    %c0_16 = arith.constant 0 : index
    %20 = vector.load %arg8[%c0_15, %c0_16] : memref<128x128xbf16, #tpu.memory_space<vmem>>, vector<128x128xbf16>
    %cst_17 = arith.constant dense<0.000000e+00> : vector<32x128xf32>
    %21 = tpu.matmul %19, %20, %cst_17 {dimension_numbers = #tpu.dot_dimension_numbers<[1], [0], [0], [1], [0, 0, 1, 1], [], []>} : vector<32x128xbf16>, vector<128x128xbf16>, vector<32x128xf32> -> vector<32x128xf32>
    %c0_18 = arith.constant 0 : index
    %c0_19 = arith.constant 0 : index
    %22 = vector.load %arg9[%c0_18, %c0_19] : memref<1x128xf32, #tpu.memory_space<vmem>>, vector<1x128xf32>
    %23 = vector.broadcast %22 : vector<1x128xf32> to vector<32x128xf32>
    %24 = arith.addf %21, %23 : vector<32x128xf32>
    %c0_20 = arith.constant 0 : index
    %c0_21 = arith.constant 0 : index
    %25 = vector.load %arg10[%c0_20, %c0_21] : memref<32x128xf32, #tpu.memory_space<vmem>>, vector<32x128xf32>
    tpu.vector_store %arg10[%c0_20, %c0_21], %24 {strides = array<i32>} : memref<32x128xf32, #tpu.memory_space<vmem>>, vector<32x128xf32>,
    return
  }
  func.func @transform_0(%arg0: i32) -> (i32, i32) {
    %c0_i32 = arith.constant 0 : i32
    %c0_i32_0 = arith.constant 0 : i32
    return %arg0, %c0_i32 : i32, i32
  }
  func.func @transform_1(%arg0: i32) -> (i32, i32) {
    %c0_i32 = arith.constant 0 : i32
    %c0_i32_0 = arith.constant 0 : i32
    %c0_i32_1 = arith.constant 0 : i32
    return %c0_i32, %c0_i32_0 : i32, i32
  }
  func.func @transform_2(%arg0: i32) -> (i32, i32) {
    %c0_i32 = arith.constant 0 : i32
    %c0_i32_0 = arith.constant 0 : i32
    %c0_i32_1 = arith.constant 0 : i32
    return %c0_i32, %c0_i32_0 : i32, i32
  }
  func.func @transform_3(%arg0: i32) -> (i32, i32) {
    %c0_i32 = arith.constant 0 : i32
    %c0_i32_0 = arith.constant 0 : i32
    %c0_i32_1 = arith.constant 0 : i32
    return %c0_i32, %c0_i32_0 : i32, i32
  }
  func.func @transform_4(%arg0: i32) -> (i32, i32) {
    %c0_i32 = arith.constant 0 : i32
    %c0_i32_0 = arith.constant 0 : i32
    %c0_i32_1 = arith.constant 0 : i32
    return %c0_i32, %c0_i32_0 : i32, i32
  }
  func.func @transform_5(%arg0: i32) -> (i32, i32) {
    %c0_i32 = arith.constant 0 : i32
    %c0_i32_0 = arith.constant 0 : i32
    %c0_i32_1 = arith.constant 0 : i32
    return %c0_i32, %c0_i32_0 : i32, i32
  }
  func.func @transform_6(%arg0: i32) -> (i32, i32) {
    %c0_i32 = arith.constant 0 : i32
    %c0_i32_0 = arith.constant 0 : i32
    %c0_i32_1 = arith.constant 0 : i32
    return %c0_i32, %c0_i32_0 : i32, i32
  }
  func.func @transform_7(%arg0: i32) -> (i32, i32) {
    %c0_i32 = arith.constant 0 : i32
    %c0_i32_0 = arith.constant 0 : i32
    %c0_i32_1 = arith.constant 0 : i32
    return %c0_i32, %c0_i32_0 : i32, i32
  }
  func.func @transform_8(%arg0: i32) -> (i32, i32) {
    %c0_i32 = arith.constant 0 : i32
    %c0_i32_0 = arith.constant 0 : i32
    %c0_i32_1 = arith.constant 0 : i32
    return %c0_i32, %c0_i32_0 : i32, i32
  }
  func.func @transform_9(%arg0: i32) -> (i32, i32) {
    %c0_i32 = arith.constant 0 : i32
    %c0_i32_0 = arith.constant 0 : i32
    return %arg0, %c0_i32 : i32, i32
  }
}

</mosaic_0001>

<bundles_post_ra>
// kernel: encoder_decoder_forward.1
= control target key start
LH: loop header
LB: loop body
LE: loop exit
PB: predicated region body
PF: predicated region fallthrough
CT: control target
= control target key end

     0   :  { %14 = vsyncpa [#allocation3], 0  ;;  %s1078_s30 = smov 0   ;;  %s1189_s0 = inlined_call_operand.vmem [shape: f32[64,128], index: 0, kind: input, shape index: {}]   ;;  %s1190_s1 = inlined_call_operand.vmem [shape: bf16[128,128], index: 1, kind: input, shape index: {}]   ;;  %s1191_s2 = inlined_call_operand.vmem [shape: f32[1,128], index: 2, kind: input, shape index: {}]   ;;  %s1192_s3 = inlined_call_operand.vmem [shape: bf16[128,128], index: 3, kind: input, shape index: {}]   ;;  %s1193_s4 = inlined_call_operand.vmem [shape: f32[1,128], index: 4, kind: input, shape index: {}]   ;;  %s1194_s5 = inlined_call_operand.vmem [shape: bf16[128,128], index: 5, kind: input, shape index: {}]   ;;  %s1195_s6 = inlined_call_operand.vmem [shape: f32[1,128], index: 6, kind: input, shape index: {}]   ;;  %s1196_s7 = inlined_call_operand.hbm [shape: bf16[128,128], index: 7, kind: input, shape index: {}]   ;;  %s1197_s8 = inlined_call_operand.vmem [shape: f32[1,128], index: 8, kind: input, shape index: {}]   ;;  %s1198_s9 = inlined_call_operand.vmem [shape: f32[64,128], index: 9, kind: output, shape index: {}]  }
   0x1 LB: > { %s274_s12 = sshll.u32 %s1196_s7, 4  ;;  %s785_s13 = sadd.s32 4294967295, %s1023_s30   ;;  %s1023_s30 = sphi %s1078_s30, %s20_s30   ;;  %s275_s12 = int_to_ptr.hbm [resolvable:$true] %s274_s12 }
   0x2   : > { %p787_p0 = scmp.ge.s32.totalorder %s1023_s30, 1  ;;  %p245_p1 = scmp.lt.s32.totalorder %s1023_s30, 3 }
   0x3   : > { %p966_p2 = scmp.eq.s32.totalorder %s785_s13, 0  ;;  %s1025_s14 = smov [#allocation2]  }
   0x4   : > { %p246_p3 = pnand %p787_p0, %p245_p1  ;;  %s276_s15 = sshll.u32 %s1025_s14, 4  ;;  %s277_s15 = int_to_ptr.vmem [resolvable:$true] %s276_s15 }
   0x5   : > { %s1026_s16 = smov 64   ;;  %s1027_s17 = smov 4  }
   0x6   : > { %p962_p4 = pneg %p246_p3  ;;  %304 = sbr.rel (%p246_p3) target bundleno = 623 (0x26f), region = 56 }
   0x8   : > { %p963_p5 = pnand %p966_p2, %p962_p4 }
   0xa   : > { %965 = dma.hbm_to_vmem [thread:$0]  (!%p963_p5), %s275_s12, 1024, %s277_s15, [#allocation3], %s1026_s16, %s1026_s16, %s1027_s17  }
   0xb   : > { %1018 = dma.done.wait (%p966_p2), [#allocation3], 1024  }
   0xc   : > { %1020 = vsyncadd (%p966_p2), [#allocation3], 4294966272  ;;  %v933_v0 = vld [vmem:[%s1190_s1 + $0x38] sm:$0xff]  ;;  %v932_v1 = vld [vmem:[%s1190_s1 + $0x30] sm:$0xff]  ;;  %s792_s24 = sshll.u32 %s785_s13, 2 }
   0xd   : > { %427 = vmatpush.bf16.msra.mxu0 %v933_v0  ;;  %v931_v2 = vld [vmem:[%s1190_s1 + $0x28] sm:$0xff]  ;;  %v930_v3 = vld [vmem:[%s1190_s1 + $0x20] sm:$0xff]  ;;  %p342_p6 = scmp.lt.s32.totalorder %s792_s24, 7  ;;  %v929_v4 = vld [vmem:[%s1190_s1 + $0x18] sm:$0xff] }
   0xe   : > { %v941_v5 = vld [vmem:[%s1192_s3 + $0x38] sm:$0xff]  ;;  %v928_v6 = vld [vmem:[%s1190_s1 + $0x10] sm:$0xff]  ;;  %v927_v8 = vld [vmem:[%s1190_s1 + $0x8] sm:$0xff] }
   0xf   : > { %s1200_s24 = smov (!%p342_p6, %s792_s24), 7  ;;  %516 = vmatpush.bf16.msra.mxu1 %v941_v5  ;;  %v940_v7 = vld [vmem:[%s1192_s3 + $0x30] sm:$0xff]  ;;  %v939_v9 = vld [vmem:[%s1192_s3 + $0x28] sm:$0xff]  ;;  %v926_v10 = vld [vmem:[%s1190_s1] sm:$0xff] }
  0x10   : > { %s793_s15 = sshll.u32 %s1200_s24, 3  ;;  %v938_v13 = vld [vmem:[%s1192_s3 + $0x20] sm:$0xff]  ;;  %v937_v15 = vld [vmem:[%s1192_s3 + $0x18] sm:$0xff]  ;;  %v936_v19 = vld [vmem:[%s1192_s3 + $0x10] sm:$0xff] }
  0x11   : > { %428 = vmatpush.bf16.msra.mxu0 %v932_v1  ;;  %s345_s20 = scalar_lea.vmem %s1189_s0, %s793_s15  ;;  %v935_v20 = vld [vmem:[%s1192_s3 + $0x8] sm:$0xff]  ;;  %v934_v21 = vld [vmem:[%s1192_s3] sm:$0xff]  ;;  %v949_v22 = vld [vmem:[%s1194_s5 + $0x38] sm:$0xff]  ;;  %s351_s26 = scalar_lea.vmem %s1198_s9, %s793_s15 }
  0x12   : > { %v353_v11 = vld [vmem:[%s345_s20] sm:$0xff]  ;;  %v354_v12 = vld [vmem:[%s345_s20 + $0x8] sm:$0xff]  ;;  %v355_v16 = vld [vmem:[%s345_s20 + $0x10] sm:$0xff]  ;;  %605 = vmatpush.bf16.msra.mxu2 %v949_v22 }
  0x13   : > { %517 = vmatpush.bf16.msra.mxu1 %v940_v7  ;;  %v357_v14 = vpack.c.bf16 %v354_v12, %v353_v11  ;;  %v356_v17 = vld [vmem:[%s345_s20 + $0x18] sm:$0xff]  ;;  %v948_v23 = vld [vmem:[%s1194_s5 + $0x30] sm:$0xff]  ;;  %v947_v25 = vld [vmem:[%s1194_s5 + $0x28] sm:$0xff] }
  0x14   : > { %v358_v18 = vpack.c.bf16 %v356_v17, %v355_v16  ;;  %v979_v26 = vld [vmem:[%s1191_s2] ss:$0 sm:$0xff]  ;;  %v945_v32 = vld [vmem:[%s1194_s5 + $0x18] sm:$0xff]  ;;  %v944_v38 = vld [vmem:[%s1194_s5 + $0x10] sm:$0xff] }
  0x15   : > { %429 = vmatpush.bf16.msra.mxu0 %v931_v2  ;;  %v946_v27 = vld [vmem:[%s1194_s5 + $0x20] sm:$0xff]  ;;  %v943_v39 = vld [vmem:[%s1194_s5 + $0x8] sm:$0xff]  ;;  %v957_v41 = vld [vmem:[#allocation2 + $0x38] sm:$0xff] }
  0x16   : > { %606 = vmatpush.bf16.msra.mxu2 %v948_v23  ;;  %v942_v40 = vld [vmem:[%s1194_s5] sm:$0xff]  ;;  %694 = vmatpush.bf16.msra.mxu3 %v957_v41  ;;  %v956_v42 = vld [vmem:[#allocation2 + $0x30] sm:$0xff]  ;;  %v955_v44 = vld [vmem:[#allocation2 + $0x28] sm:$0xff] }
  0x17   : > { %518 = vmatpush.bf16.msra.mxu1 %v939_v9  ;;  %v980_v45 = vld [vmem:[%s1193_s4] ss:$0 sm:$0xff]  ;;  %v953_v51 = vld [vmem:[#allocation2 + $0x18] sm:$0xff]  ;;  %v952_v57 = vld [vmem:[#allocation2 + $0x10] sm:$0xff] }
  0x18   : > { %v954_v46 = vld [vmem:[#allocation2 + $0x20] sm:$0xff]  ;;  %v951_v58 = vld [vmem:[#allocation2 + $0x8] sm:$0xff] }
  0x19   : > { %430 = vmatpush.bf16.msra.mxu0 %v930_v3  ;;  %v950_v59 = vld [vmem:[#allocation2] sm:$0xff] }
  0x1a   : > { %607 = vmatpush.bf16.msra.mxu2 %v947_v25  ;;  %695 = vmatpush.bf16.msra.mxu3 %v956_v42  ;;  %v981_v61 = vld [vmem:[%s1195_s6] ss:$0 sm:$0xff] }
  0x1b   : > { %519 = vmatpush.bf16.msra.mxu1 %v938_v13  ;;  %v982_v7 = vld [vmem:[%s1197_s8] ss:$0 sm:$0xff] }
  0x1d   : > { %431 = vmatpush.bf16.msra.mxu0 %v929_v4 }
  0x1e   : > { %608 = vmatpush.bf16.msra.mxu2 %v946_v27  ;;  %696 = vmatpush.bf16.msra.mxu3 %v955_v44 }
  0x1f   : > { %520 = vmatpush.bf16.msra.mxu1 %v937_v15 }
  0x21   : > { %432 = vmatpush.bf16.msra.mxu0 %v928_v6 }
  0x22   : > { %609 = vmatpush.bf16.msra.mxu2 %v945_v32  ;;  %697 = vmatpush.bf16.msra.mxu3 %v954_v46 }
  0x23   : > { %521 = vmatpush.bf16.msra.mxu1 %v936_v19 }
  0x25   : > { %433 = vmatpush.bf16.msra.mxu0 %v927_v8 }
  0x26   : > { %610 = vmatpush.bf16.msra.mxu2 %v944_v38  ;;  %698 = vmatpush.bf16.msra.mxu3 %v953_v51 }
  0x27   : > { %522 = vmatpush.bf16.msra.mxu1 %v935_v20 }
  0x29   : > { %434 = vmatpush.bf16.msra.mxu0 %v926_v10 }
  0x2a   : > { %611 = vmatpush.bf16.msra.mxu2 %v943_v39  ;;  %699 = vmatpush.bf16.msra.mxu3 %v952_v57 }
  0x2b   : > { %523 = vmatpush.bf16.msra.mxu1 %v934_v21 }
  0x2c   : > { %435 = vmatmul.bf16.vlgmr.msra.gmra.mxu0 %v357_v14 }
  0x2e   : > { %612 = vmatpush.bf16.msra.mxu2 %v942_v40  ;;  %700 = vmatpush.bf16.msra.mxu3 %v951_v58 }
  0x32   : > { %701 = vmatpush.bf16.msra.mxu3 %v950_v59 }
  0x3c   : > { %440 = vmatmul.bf16.gmra.mxu0 %v358_v18 }
  0xa9   : > { %v436_v24 = vpop.f32.mrf.mxu0 }
  0xaa   : > { %v437_v29 = vadd.f32 %v979_v26, %v436_v24 }
  0xb1   : > { %v438_v28 = vpop.f32.mrf.mxu0 }
  0xb2   : > { %v439_v30 = vadd.f32 %v979_v26, %v438_v28 }
  0xb4   : > { %v446_v31 = vpack.c.bf16 %v439_v30, %v437_v29 }
  0xb6   : > { %524 = vmatmul.bf16.vlgmr.msra.gmra.mxu1 %v446_v31 }
  0xb9   : > { %v441_v33 = vpop.f32.mrf.mxu0 }
  0xba   : > { %v442_v35 = vadd.f32 %v979_v26, %v441_v33 }
  0xc1   : > { %v443_v34 = vpop.f32.mrf.mxu0 }
  0xc2   : > { %v444_v36 = vadd.f32 %v979_v26, %v443_v34 }
  0xc4   : > { %v447_v37 = vpack.c.bf16 %v444_v36, %v442_v35 }
  0xc6   : > { %529 = vmatmul.bf16.gmra.mxu1 %v447_v37 }
 0x133   : > { %v525_v43 = vpop.f32.mrf.mxu1 }
 0x134   : > { %v526_v48 = vadd.f32 %v980_v45, %v525_v43 }
 0x13b   : > { %v527_v47 = vpop.f32.mrf.mxu1 }
 0x13c   : > { %v528_v49 = vadd.f32 %v980_v45, %v527_v47 }
 0x13e   : > { %v535_v50 = vpack.c.bf16 %v528_v49, %v526_v48 }
 0x140   : > { %613 = vmatmul.bf16.vlgmr.msra.gmra.mxu2 %v535_v50 }
 0x143   : > { %v530_v52 = vpop.f32.mrf.mxu1 }
 0x144   : > { %v531_v54 = vadd.f32 %v980_v45, %v530_v52 }
 0x14b   : > { %v532_v53 = vpop.f32.mrf.mxu1 }
 0x14c   : > { %v533_v55 = vadd.f32 %v980_v45, %v532_v53 }
 0x14e   : > { %v536_v56 = vpack.c.bf16 %v533_v55, %v531_v54 }
 0x150   : > { %618 = vmatmul.bf16.gmra.mxu2 %v536_v56 }
 0x1c3   : > { %v614_v60 = vpop.f32.mrf.mxu2 }
 0x1c4   : > { %v615_v63 = vadd.f32 %v981_v61, %v614_v60 }
 0x1cb   : > { %v616_v62 = vpop.f32.mrf.mxu2 }
 0x1cc   : > { %v617_v0 = vadd.f32 %v981_v61, %v616_v62 }
 0x1ce   : > { %v624_v1 = vpack.c.bf16 %v617_v0, %v615_v63 }
 0x1d0   : > { %702 = vmatmul.bf16.vlgmr.msra.gmra.mxu3 %v624_v1 }
 0x1d3   : > { %v619_v2 = vpop.f32.mrf.mxu2 }
 0x1d4   : > { %v620_v4 = vadd.f32 %v981_v61, %v619_v2 }
 0x1db   : > { %v621_v3 = vpop.f32.mrf.mxu2 }
 0x1dc   : > { %v622_v5 = vadd.f32 %v981_v61, %v621_v3 }
 0x1de   : > { %v625_v6 = vpack.c.bf16 %v622_v5, %v620_v4 }
 0x1e0   : > { %707 = vmatmul.bf16.gmra.mxu3 %v625_v6 }
 0x253   : > { %v703_v8 = vpop.f32.mrf.mxu3 }
 0x254   : > { %v704_v9 = vadd.f32 %v982_v7, %v703_v8 }
 0x256   : > { %713 = vst [vmem:[%s351_s26] sm:$0xff] %v704_v9 }
 0x25b   : > { %v705_v10 = vpop.f32.mrf.mxu3 }
 0x25c   : > { %v706_v11 = vadd.f32 %v982_v7, %v705_v10 }
 0x25e   : > { %714 = vst [vmem:[%s351_s26 + $0x8] sm:$0xff] %v706_v11 }
 0x263   : > { %v708_v12 = vpop.f32.mrf.mxu3 }
 0x264   : > { %v709_v13 = vadd.f32 %v982_v7, %v708_v12 }
 0x266   : > { %715 = vst [vmem:[%s351_s26 + $0x10] sm:$0xff] %v709_v13 }
 0x26b   : > { %v710_v14 = vpop.f32.mrf.mxu3 }
 0x26c   : > { %v711_v15 = vadd.f32 %v982_v7, %v710_v14 }
 0x26e   : > { %716 = vst [vmem:[%s351_s26 + $0x18] sm:$0xff] %v711_v15 }
 0x26f PF: > { %s20_s30 = sadd.s32 1, %s1023_s30  }
 0x270   : > { %p17_p7 = scmp.ge.s32.totalorder %s20_s30, 4  }
 0x272   :  { %19 = sbr.rel (!%p17_p7) target bundleno = 1 (0x1), region = 91 }
 0x277   :  { %739 = vsyncpa [#allocation3], 1 }
 0x278   :  { %741 = vsyncpa [#allocation3 + $0x1], 1 }

</bundles_post_ra>
